<compile_context>
chip_gen: v7x
topology: tpu7x:2x2x1
jax: 0.10.0
libtpu: 0.0.40
codegen_flags: <defaults>
</compile_context>

<pallas_src>
import functools
import math

import jax
import jax.numpy as jnp
from jax.experimental import pallas as pl
from jax.experimental.pallas import tpu as pltpu


def _choose_tile_m(m, c, target_bytes):
    """Rows per x tile: ~target_bytes per pipeline buffer, multiple of 8."""
    t = max(8, (target_bytes // (c * 4)) // 8 * 8)
    if t >= m:
        return m          # single full-extent tile
    return t              # multiple of 8, strictly smaller than m


def _rowsum_linear_kernel(x_ref, wt_ref, b_ref, o_ref, acc_ref, *, n_rows, m_rows):
    """Accumulate row-sums of x tiles; finalize with one tiny matvec + N*b."""
    i = pl.program_id(0)
    nsteps = pl.num_programs(0)
    tile_m = x_ref.shape[0]

    @pl.when(i == 0)
    def _init():
        acc_ref[...] = jnp.zeros_like(acc_ref)

    # Hot path: pure (TM, C) -> (1, C) row reduction (VPU adds + one XLU
    # sublane reduce per tile; both hidden behind the HBM-bound DMA stream).
    def accumulate(masked):
        xv = x_ref[...]
        if masked:
            # Last tile may extend past the slab; zero out-of-bounds rows with
            # a select (no arithmetic on garbage -> NaN/Inf safe).
            rows_left = m_rows - i * tile_m
            rid = jax.lax.broadcasted_iota(jnp.int32, xv.shape, 0)
            xv = jnp.where(rid < rows_left, xv, 0.0)
        acc_ref[...] += jnp.sum(xv, axis=0, keepdims=True)

    ragged = (m_rows % tile_m) != 0  # static (Python) -> specialize trace

    if ragged:
        @pl.when(i < nsteps - 1)
        def _full():
            accumulate(False)

        @pl.when(i == nsteps - 1)
        def _partial():
            accumulate(True)
    else:
        accumulate(False)

    @pl.when(i == nsteps - 1)
    def _finalize():
        # One tiny matvec on the accumulated row-sum, bias added once as N*b.
        o = jnp.dot(acc_ref[...], wt_ref[...], preferred_element_type=jnp.float32)
        o_ref[...] = (o + jnp.float32(n_rows) * b_ref[...]).astype(o_ref.dtype)


def linear_rowsum(x_slab, wt_exp, bias_row, n_rows, tile_m):
    """x_slab: (M, C) f32, wt_exp: (C, F) f32, bias_row: (1, F) f32 -> (1, F)."""
    m, c = x_slab.shape
    f = wt_exp.shape[1]
    grid = (pl.cdiv(m, tile_m),)

    kernel = functools.partial(_rowsum_linear_kernel, n_rows=n_rows, m_rows=m)
    cost = pl.CostEstimate(
        flops=m * c + 2 * c * f,
        transcendentals=0,
        bytes_accessed=m * c * 4 + c * f * 4 + 2 * f * 4,
    )
    return pl.pallas_call(
        kernel,
        out_shape=jax.ShapeDtypeStruct((1, f), jnp.float32),
        grid=grid,
        in_specs=[
            pl.BlockSpec((tile_m, c), lambda i: (i, 0)),   # pipelined x tiles
            pl.BlockSpec((c, f), lambda i: (0, 0)),        # resident weights
            pl.BlockSpec((1, f), lambda i: (0, 0)),        # resident bias
        ],
        out_specs=pl.BlockSpec((1, f), lambda i: (0, 0)),  # resident output
        scratch_shapes=[pltpu.VMEM((1, c), jnp.float32)],  # row-sum accumulator
        compiler_params=pltpu.CompilerParams(
            dimension_semantics=("arbitrary",),            # reduction axis
        ),
        cost_estimate=cost,
    )(x_slab, wt_exp, bias_row)


class LinearPallas:
    """Pallas port of cloudpred.main.Linear."""

    # Below this many elements, kernel-launch overhead dominates -> plain XLA.
    MIN_KERNEL_ELEMS = 4096
    # Cap on the lane-densified row width (bounds the resident W.T tile).
    MAX_FOLD_C = 4096

    def __init__(self, dim, states, key=None, tile_target_bytes=2 * 1024 * 1024):
        self.dim = dim
        self.states = states
        self.tile_target_bytes = tile_target_bytes
        out_features = 1 if states == 1 else states - 1
        # NOTE: the PyTorch module zero-initializes weight/bias (trained later).
        # Deterministic non-zero params here so the kernel does non-trivial
        # work; zeros reproduce the untrained module exactly.
        if key is None:
            key = jax.random.PRNGKey(0)
        kw, kb = jax.random.split(key)
        self.weight = jax.random.normal(kw, (out_features, dim), jnp.float32) * 0.02
        self.bias = jax.random.normal(kb, (out_features,), jnp.float32) * 0.02

    def _head(self, s):
        if self.states == 1:
            return s
        return jnp.concatenate([jnp.zeros((1, 1), jnp.float32), s], axis=1)

    def _fold_params(self, d):
        """Smallest fold factor r so C = d*r is a multiple of 128 (lane dense)."""
        r = 128 // math.gcd(d, 128)
        c = d * r
        if c > self.MAX_FOLD_C:
            return 1, d           # expansion too large; keep natural width
        return r, c

    def __call__(self, x):
        x = jnp.asarray(x, jnp.float32)
        n, d = x.shape
        assert d == self.dim
        if n * d < self.MIN_KERNEL_ELEMS:
            # Tiny-input bypass: dispatch/per-step overhead would dominate.
            return self.reference(x)

        f = self.weight.shape[0]
        r, c = self._fold_params(d)
        total = n * d

        if total % c == 0:
            # Contiguous reshape: free (no HBM copy) -- the common fast path.
            x_slab = x.reshape(total // c, c)
        else:
            # Needs < C trailing zeros, but XLA pad materializes one extra copy
            # of x.  Zero pad has no effect on the row-sum.
            pad = c - total % c
            flat = jnp.pad(x.reshape(-1), (0, pad))
            x_slab = flat.reshape((total + pad) // c, c)

        m = x_slab.shape[0]
        tile_m = _choose_tile_m(m, c, self.tile_target_bytes)

        # Folding r rows per slab row is linear, so it is absorbed by
        # vertically tiling W.T:  rowsum(slab) @ tile(W.T) == rowsum(x) @ W.T
        wt_exp = jnp.tile(self.weight.T, (r, 1)) if r > 1 else self.weight.T
        bias_row = self.bias.reshape(1, f)

        s = linear_rowsum(x_slab, wt_exp, bias_row, n, tile_m)
        # TODO(synk): on v7x, split the M axis across the 2 TensorCores with a
        # leading "parallel" grid dim emitting (2, F) partials summed outside.
        return self._head(s)

    def reference(self, x):
        y = jnp.dot(x, self.weight.T, precision=jax.lax.Precision.HIGHEST)
        s = jnp.sum(y + self.bias, axis=-2, keepdims=True)
        return self._head(s)


if __name__ == "__main__":
    key = jax.random.PRNGKey(0)
    kx1, kx2, kx3, kx4, kp1, kp2, kp3 = jax.random.split(key, 7)

    # (1) states > 1, lane-dense zero-copy fold (D | 128, N*D % 128 == 0),
    #     small tiles so grid > 1 with a ragged (masked) last tile.
    N, DIM, STATES = 1000, 32, 4
    x = jax.random.normal(kx1, (N, DIM), jnp.float32)
    mod = LinearPallas(DIM, STATES, key=kp1, tile_target_bytes=32 * 1024)
    out = jax.block_until_ready(mod(x))
    ref = mod.reference(x)
    assert out.shape == (1, STATES), out.shape
    assert jnp.allclose(out, ref, atol=1e-3, rtol=1e-3), (out, ref)

    # (2) states == 1, evenly divided grid (init / accumulate / finalize).
    mod1 = LinearPallas(DIM, 1, key=kp2, tile_target_bytes=32 * 1024)
    x1 = jax.random.normal(kx2, (1024, DIM), jnp.float32)
    out1 = jax.block_until_ready(mod1(x1))
    ref1 = mod1.reference(x1)
    assert out1.shape == (1, 1), out1.shape
    assert jnp.allclose(out1, ref1, atol=1e-3, rtol=1e-3), (out1, ref1)

    # (3) D does not divide 128 -> lcm fold (C = 384); N*D % C != 0 -> pad path.
    mod2 = LinearPallas(48, 3, key=kp3)
    x2 = jax.random.normal(kx3, (250, 48), jnp.float32)
    out2 = jax.block_until_ready(mod2(x2))
    ref2 = mod2.reference(x2)
    assert out2.shape == (1, 3), out2.shape
    assert jnp.allclose(out2, ref2, atol=1e-3, rtol=1e-3), (out2, ref2)

    # (4) D does not divide 128, zero-copy fold (N*D % 384 == 0), single tile.
    mod2b = LinearPallas(48, 3, key=kp3)
    x2b = jax.random.normal(kx4, (256, 48), jnp.float32)
    out2b = jax.block_until_ready(mod2b(x2b))
    assert jnp.allclose(out2b, mod2b.reference(x2b), atol=1e-3, rtol=1e-3)

    # (5) tiny input -> XLA bypass path.
    mod3 = LinearPallas(DIM, STATES, key=kp1)
    xt = jax.random.normal(kx2, (8, DIM), jnp.float32)
    outt = jax.block_until_ready(mod3(xt))
    assert outt.shape == (1, STATES), outt.shape
    assert jnp.allclose(outt, mod3.reference(xt), atol=1e-5, rtol=1e-5)

    print("KERNEL_OK")
</pallas_src>

<mosaic_0001>
module attributes {stable_mosaic.version = 11 : i64} {
  func.func @_rowsum_linear_kernel(%arg0: i32, %arg1: memref<64x128xf32, #tpu.memory_space<vmem>>, %arg2: memref<128x3xf32, #tpu.memory_space<vmem>>, %arg3: memref<1x3xf32, #tpu.memory_space<vmem>>, %arg4: memref<1x3xf32, #tpu.memory_space<vmem>>, %arg5: memref<1x128xf32, #tpu.memory_space<vmem>>) attributes {dimension_semantics = [#tpu.dimension_semantics<arbitrary>], iteration_bounds = array<i64: 4>, scalar_prefetch = 0 : i64, scratch_operands = 1 : i64, tpu.core_type = #tpu.core_type<tc>, window_params = [{transform_indices = @transform_0, window_bounds = array<i64: 64, 128>}, {pipeline_mode = #tpu.pipeline_mode<synchronous>, transform_indices = @transform_1, window_bounds = array<i64: 128, 3>}, {pipeline_mode = #tpu.pipeline_mode<synchronous>, transform_indices = @transform_2, window_bounds = array<i64: 1, 3>}, {pipeline_mode = #tpu.pipeline_mode<synchronous>, transform_indices = @transform_3, window_bounds = array<i64: 1, 3>}]} {
    %c0_i32 = arith.constant 0 : i32
    %0 = arith.cmpi eq, %arg0, %c0_i32 : i32
    %1 = arith.extui %0 : i1 to i32
    %c0_i32_0 = arith.constant 0 : i32
    %2 = arith.cmpi ne, %1, %c0_i32_0 : i32
    scf.if %2 {
      %cst = arith.constant 0.000000e+00 : f32
      %12 = vector.broadcast %cst : f32 to vector<1x128xf32>
      %c0 = arith.constant 0 : index
      %c0_6 = arith.constant 0 : index
      %13 = vector.load %arg5[%c0, %c0_6] : memref<1x128xf32, #tpu.memory_space<vmem>>, vector<1x128xf32>
      tpu.vector_store %arg5[%c0, %c0_6], %12 {strides = array<i32>} : memref<1x128xf32, #tpu.memory_space<vmem>>, vector<1x128xf32>,
    } else {
    }
    %c3_i32 = arith.constant 3 : i32
    %3 = arith.cmpi slt, %arg0, %c3_i32 : i32
    %4 = arith.extui %3 : i1 to i32
    %c0_i32_1 = arith.constant 0 : i32
    %5 = arith.cmpi ne, %4, %c0_i32_1 : i32
    scf.if %5 {
      %c0 = arith.constant 0 : index
      %c0_6 = arith.constant 0 : index
      %12 = vector.load %arg1[%c0, %c0_6] : memref<64x128xf32, #tpu.memory_space<vmem>>, vector<64x128xf32>
      %c0_7 = arith.constant 0 : index
      %c0_8 = arith.constant 0 : index
      %13 = vector.load %arg5[%c0_7, %c0_8] : memref<1x128xf32, #tpu.memory_space<vmem>>, vector<1x128xf32>
      %cst = arith.constant dense<0.000000e+00> : vector<128xf32>
      %14 = vector.multi_reduction <add>, %12, %cst [0] : vector<64x128xf32> to vector<128xf32>
      %15 = vector.shape_cast %14 : vector<128xf32> to vector<1x128xf32>
      %16 = arith.addf %13, %15 : vector<1x128xf32>
      %c0_9 = arith.constant 0 : index
      %c0_10 = arith.constant 0 : index
      %17 = vector.load %arg5[%c0_9, %c0_10] : memref<1x128xf32, #tpu.memory_space<vmem>>, vector<1x128xf32>
      tpu.vector_store %arg5[%c0_9, %c0_10], %16 {strides = array<i32>} : memref<1x128xf32, #tpu.memory_space<vmem>>, vector<1x128xf32>,
    } else {
    }
    %c3_i32_2 = arith.constant 3 : i32
    %6 = arith.cmpi eq, %arg0, %c3_i32_2 : i32
    %7 = arith.extui %6 : i1 to i32
    %c0_i32_3 = arith.constant 0 : i32
    %8 = arith.cmpi ne, %7, %c0_i32_3 : i32
    scf.if %8 {
      %c0 = arith.constant 0 : index
      %c0_6 = arith.constant 0 : index
      %12 = vector.load %arg1[%c0, %c0_6] : memref<64x128xf32, #tpu.memory_space<vmem>>, vector<64x128xf32>
      %c64_i32 = arith.constant 64 : i32
      %13 = arith.muli %arg0, %c64_i32 : i32
      %c250_i32 = arith.constant 250 : i32
      %14 = arith.subi %c250_i32, %13 : i32
      %15 = tpu.iota {dimensions = array<i32: 0>} : vector<64x128xi32>
      %16 = vector.broadcast %14 : i32 to vector<64x128xi32>
      %17 = arith.cmpi slt, %15, %16 : vector<64x128xi32>
      %cst = arith.constant 0.000000e+00 : f32
      %18 = vector.broadcast %cst : f32 to vector<64x128xf32>
      %19 = arith.select %17, %12, %18 : vector<64x128xi1>, vector<64x128xf32>
      %c0_7 = arith.constant 0 : index
      %c0_8 = arith.constant 0 : index
      %20 = vector.load %arg5[%c0_7, %c0_8] : memref<1x128xf32, #tpu.memory_space<vmem>>, vector<1x128xf32>
      %cst_9 = arith.constant dense<0.000000e+00> : vector<128xf32>
      %21 = vector.multi_reduction <add>, %19, %cst_9 [0] : vector<64x128xf32> to vector<128xf32>
      %22 = vector.shape_cast %21 : vector<128xf32> to vector<1x128xf32>
      %23 = arith.addf %20, %22 : vector<1x128xf32>
      %c0_10 = arith.constant 0 : index
      %c0_11 = arith.constant 0 : index
      %24 = vector.load %arg5[%c0_10, %c0_11] : memref<1x128xf32, #tpu.memory_space<vmem>>, vector<1x128xf32>
      tpu.vector_store %arg5[%c0_10, %c0_11], %23 {strides = array<i32>} : memref<1x128xf32, #tpu.memory_space<vmem>>, vector<1x128xf32>,
    } else {
    }
    %c3_i32_4 = arith.constant 3 : i32
    %9 = arith.cmpi eq, %arg0, %c3_i32_4 : i32
    %10 = arith.extui %9 : i1 to i32
    %c0_i32_5 = arith.constant 0 : i32
    %11 = arith.cmpi ne, %10, %c0_i32_5 : i32
    scf.if %11 {
      %c0 = arith.constant 0 : index
      %c0_6 = arith.constant 0 : index
      %12 = vector.load %arg5[%c0, %c0_6] : memref<1x128xf32, #tpu.memory_space<vmem>>, vector<1x128xf32>
      %c0_7 = arith.constant 0 : index
      %c0_8 = arith.constant 0 : index
      %13 = vector.load %arg2[%c0_7, %c0_8] : memref<128x3xf32, #tpu.memory_space<vmem>>, vector<128x3xf32>
      %cst = arith.constant dense<0.000000e+00> : vector<1x3xf32>
      %14 = tpu.matmul %12, %13, %cst {dimension_numbers = #tpu.dot_dimension_numbers<[1], [0], [0], [1], [0, 0, 1, 1], [], []>} : vector<1x128xf32>, vector<128x3xf32>, vector<1x3xf32> -> vector<1x3xf32>
      %c0_9 = arith.constant 0 : index
      %c0_10 = arith.constant 0 : index
      %15 = vector.load %arg3[%c0_9, %c0_10] : memref<1x3xf32, #tpu.memory_space<vmem>>, vector<1x3xf32>
      %cst_11 = arith.constant 1.000000e+03 : f32
      %16 = vector.broadcast %cst_11 : f32 to vector<1x3xf32>
      %17 = arith.mulf %16, %15 : vector<1x3xf32>
      %18 = arith.addf %14, %17 : vector<1x3xf32>
      %c0_12 = arith.constant 0 : index
      %c0_13 = arith.constant 0 : index
      %19 = vector.load %arg4[%c0_12, %c0_13] : memref<1x3xf32, #tpu.memory_space<vmem>>, vector<1x3xf32>
      tpu.vector_store %arg4[%c0_12, %c0_13], %18 {strides = array<i32>} : memref<1x3xf32, #tpu.memory_space<vmem>>, vector<1x3xf32>,
    } else {
    }
    return
  }
  func.func @transform_0(%arg0: i32) -> (i32, i32) {
    %c0_i32 = arith.constant 0 : i32
    %c0_i32_0 = arith.constant 0 : i32
    return %arg0, %c0_i32 : i32, i32
  }
  func.func @transform_1(%arg0: i32) -> (i32, i32) {
    %c0_i32 = arith.constant 0 : i32
    %c0_i32_0 = arith.constant 0 : i32
    %c0_i32_1 = arith.constant 0 : i32
    return %c0_i32, %c0_i32_0 : i32, i32
  }
  func.func @transform_2(%arg0: i32) -> (i32, i32) {
    %c0_i32 = arith.constant 0 : i32
    %c0_i32_0 = arith.constant 0 : i32
    %c0_i32_1 = arith.constant 0 : i32
    return %c0_i32, %c0_i32_0 : i32, i32
  }
  func.func @transform_3(%arg0: i32) -> (i32, i32) {
    %c0_i32 = arith.constant 0 : i32
    %c0_i32_0 = arith.constant 0 : i32
    %c0_i32_1 = arith.constant 0 : i32
    return %c0_i32, %c0_i32_0 : i32, i32
  }
}

</mosaic_0001>

<bundles_post_ra>
// kernel: tpu_custom_call.1
= control target key start
LH: loop header
LB: loop body
LE: loop exit
PB: predicated region body
PF: predicated region fallthrough
CT: control target
= control target key end

     0   :  { %8 = vsyncpa [#allocation4], 0  ;;  %s891_s0 = inlined_call_operand.hbm [shape: f32[250,128], index: 0, kind: input, shape index: {}]   ;;  %s892_s1 = inlined_call_operand.vmem [shape: f32[128,3], index: 1, kind: input, shape index: {}]   ;;  %s893_s2 = inlined_call_operand.vmem [shape: f32[1,3], index: 2, kind: input, shape index: {}]   ;;  %s894_s3 = inlined_call_operand.hbm [shape: f32[1,3], index: 3, kind: output, shape index: {}]  }
   0x1   :  { %10 = vsyncpa [#allocation4 + $0x1], 0 }
   0x2   :  { %11 = vsyncpa [#allocation5], 0  ;;  %s684_s12 = smov 0   ;;  %s686_s13 = smov 0  }
   0x3   :  { %s688_s14 = smov 0   ;;  %s690_s15 = smov 0  }
   0x4 LB: > { %s703_s16 = sadd.s32 4294967295, %s654_s15   ;;  %s706_s17 = sadd.s32 1, %s654_s15   ;;  %s654_s15 = sphi %s690_s15, %s901_s15   ;;  %s650_s14 = sphi %s688_s14, %s900_s14   ;;  %s646_s13 = sphi %s686_s13, %s899_s13   ;;  %s642_s12 = sphi %s684_s12, %s898_s12  }
   0x5   : > { %s21_s18 = ssub.s32 %s654_s15, %s706_s17  ;;  %s24_s19 = sadd.s32 1, %s650_s14 }
   0x6   : > { %p22_p0 = scmp.eq.s32.totalorder %s21_s18, 0  ;;  %p31_p1 = scmp.ne.s32.totalorder %s650_s14, %s646_s13 }
   0x7   : > { %p32_p2 = scmp.eq.s32.totalorder %s654_s15, 0  ;;  %p37_p3 = scmp.ne.s32.totalorder %s646_s13, %s642_s12 }
   0x8   : > { %s716_s20 = scalar_select %p22_p0, %s650_s14, %s24_s19  }
   0x9   : > { %p33_p4 = por %p32_p2, %p31_p1  ;;  %p38_p5 = scmp.eq.s32.totalorder %s703_s16, 0 }
   0xa   : > { %p518_p6 = scmp.lt.s32.totalorder %s654_s15, 4  ;;  %s130_s22 = sand.u32 1, %s650_s14  }
   0xb   : > { %p720_p7 = por %p38_p5, %p37_p3  ;;  %s418_s23 = sshll.u32 %s130_s22, 6 }
   0xc   : > { %s431_s24 = sshll.u32 %s654_s15, 10  ;;  %s134_s28 = scalar_lea.vmem [#allocation3], %s418_s23 }
   0xd   : > { %s729_s27 = scalar_lea.hbm %s891_s0, %s431_s24  ;;  %s141_s29 = sshll.u32 %s134_s28, 4  ;;  %s731_s29 = int_to_ptr.vmem [resolvable:$true] %s141_s29 }
   0xe   : > { %p733_p8 = pnand %p518_p6, %p33_p4  ;;  %s738_s4 = scalar_lea.sflag [#allocation4], %s130_s22 }
   0xf   : > { %s560_s5 = scalar_lea.hbm %s729_s27, 1024  ;;  %s565_s8 = scalar_lea.hbm %s891_s0, 4096 }
  0x10   : > { %p561_p10 = scmp.ne.s32.totalorder %s729_s27, %s560_s5  ;;  %p562_p11 = pneg %p733_p8 }
  0x11   : > { %p566_p0 = scmp.lt.u32.totalorder %s729_s27, %s891_s0  ;;  %p567_p1 = scmp.lt.u32.totalorder %s565_s8, %s560_s5 }
  0x12   : > { %p563_p12 = pnand %p562_p11, %p561_p10  ;;  %p569_p3 = scmp.lt.u32.totalorder %s560_s5, %s729_s27 }
  0x13   : > { %p568_p2 = por %p567_p1, %p566_p0 }
  0x14   : > { %p564_p13 = pneg %p563_p12 }
  0x15   : > { %p570_p4 = por %p569_p3, %p568_p2 }
  0x17   : > { %p571_p5 = pnand %p570_p4, %p564_p13 }
  0x19   : > { %574 = shalt.err (!%p571_p5)
}
  0x1a   : > { %s575_s11 = scalar_lea.vmem %s731_s29, 1024  ;;  %s656_s12 = smov [#allocation3]  }
  0x1b   : > { %p576_p6 = scmp.ne.s32.totalorder %s731_s29, %s575_s11  ;;  %s580_s18 = sshll.u32 %s656_s12, 4  ;;  %s581_s18 = int_to_ptr.vmem [resolvable:$false] %s580_s18 }
  0x1c   : > { %s582_s19 = scalar_lea.vmem %s581_s18, 2048  ;;  %p583_p9 = scmp.lt.s32.totalorder %s731_s29, %s581_s18 }
  0x1d   : > { %p578_p10 = pnand %p576_p6, %p562_p11  ;;  %p584_p0 = scmp.lt.s32.totalorder %s582_s19, %s575_s11 }
  0x1f   : > { %p579_p12 = pneg %p578_p10  ;;  %p585_p1 = por %p584_p0, %p583_p9 }
  0x21   : > { %p586_p2 = pnand %p585_p1, %p579_p12 }
  0x23   : > { %589 = shalt.err (!%p586_p2)
}
  0x24   : > { %s657_s22 = smov 128   ;;  %s658_s23 = smov 8  }
  0x25   : > { %517 = dma.hbm_to_vmem [thread:$0]  (!%p733_p8), %s729_s27, 1024, %s731_s29, %s738_s4, %s657_s22, %s657_s22, %s658_s23  }
  0x26   : > { %p149_p11 = scmp.lt.s32.totalorder %s654_s15, 5  ;;  %p897_p13 = scmp.ge.s32.totalorder %s654_s15, 1 }
  0x28   : > { %p150_p3 = pnand %p897_p13, %p149_p11 }
  0x29   : > { %s155_s24 = sand.u32 (!%p150_p3), 1, %s646_s13  }
  0x2a   : > { %153 = sbr.rel (%p150_p3) target bundleno = 375 (0x177), region = 32  ;;  %s422_s25 = sshll.u32 (!%p150_p3), %s155_s24, 6 }
  0x2b   : > { %s156_s26 = scalar_lea.sflag (!%p150_p3), [#allocation4], %s155_s24  ;;  %s770_s28 = scalar_lea.vmem (!%p150_p3), [#allocation3], %s422_s25 }
  0x31   : > { %633 = dma.done.wait (%p720_p7), %s156_s26, 1024  }
  0x32   : > { %635 = vsyncadd (%p720_p7), %s156_s26, 4294966272  ;;  %p423_p9 = scmp.ne.s32.totalorder %s703_s16, 0 }
  0x33   : > { %v659_v0 = vmov (!%p423_p9), 0.0  }
  0x34   : > { %181 = sbr.rel (%p423_p9) target bundleno = 59 (0x3b), region = 40  ;;  %182 = vst [vmem:[#allocation2] sm:$0x1] (!%p423_p9), %v659_v0 }
  0x3b PF: > { %p424_p8 = scmp.ge.s32.totalorder %s703_s16, 3 }
  0x3c   : > { %v187_v1 = vld [vmem:[%s770_s28] sm:$0xff] (!%p424_p8)  ;;  %v188_v2 = vld [vmem:[%s770_s28 + $0x8] sm:$0xff] (!%p424_p8)  ;;  %v189_v3 = vld [vmem:[%s770_s28 + $0x10] sm:$0xff] (!%p424_p8) }
  0x3d   : > { %186 = sbr.rel (%p424_p8) target bundleno = 90 (0x5a), region = 44  ;;  %v196_v4 = vadd.f32 (!%p424_p8), %v188_v2, %v187_v1  ;;  %v190_v5 = vld [vmem:[%s770_s28 + $0x18] sm:$0xff] (!%p424_p8)  ;;  %v191_v7 = vld [vmem:[%s770_s28 + $0x20] sm:$0xff] (!%p424_p8)  ;;  %v192_v9 = vld [vmem:[%s770_s28 + $0x28] sm:$0xff] (!%p424_p8) }
  0x3e   : > { %v193_v11 = vld [vmem:[%s770_s28 + $0x30] sm:$0xff] (!%p424_p8)  ;;  %v194_v13 = vld [vmem:[%s770_s28 + $0x38] sm:$0xff] (!%p424_p8) }
  0x3f   : > { %v197_v6 = vadd.f32 (!%p424_p8), %v196_v4, %v189_v3  ;;  %v195_v21 = vld [vmem:[#allocation2] sm:$0x1] (!%p424_p8) }
  0x41   : > { %v198_v8 = vadd.f32 (!%p424_p8), %v197_v6, %v190_v5 }
  0x43   : > { %v199_v10 = vadd.f32 (!%p424_p8), %v198_v8, %v191_v7 }
  0x45   : > { %v200_v12 = vadd.f32 %v199_v10, %v192_v9 }
  0x47   : > { %v201_v14 = vadd.f32 %v200_v12, %v193_v11 }
  0x49   : > { %v202_v15 = vadd.f32 %v201_v14, %v194_v13 }
  0x4b   : > { %v203_v16 = vrot.slane %v202_v15, 4 }
  0x4d   : > { %v204_v17 = vadd.f32 %v203_v16, %v202_v15 }
  0x4f   : > { %v205_v18 = vrot.slane %v204_v17, 2 }
  0x51   : > { %v206_v19 = vadd.f32 %v205_v18, %v204_v17 }
  0x53   : > { %v207_v20 = vrot.slane %v206_v19, 1 }
  0x55   : > { %v208_v22 = vadd.f32 %v207_v20, %v206_v19 }
  0x57   : > { %v209_v23 = vadd.f32 %v208_v22, %v195_v21 }
  0x59   : > { %210 = vst [vmem:[#allocation2] sm:$0x1] %v209_v23 }
  0x5a PF: > { %p425_p7 = scmp.ne.s32.totalorder %s703_s16, 3 }
  0x5b   : > { %v268_v24 = vld [vmem:[%s892_s1] sm:$0xff] (!%p425_p7)  ;;  %v269_v25 = vld [vmem:[%s892_s1 + $0x8] sm:$0xff] (!%p425_p7)  ;;  %v270_v26 = vld [vmem:[%s892_s1 + $0x10] sm:$0xff] (!%p425_p7)  ;;  %v225_v27 = vlaneseq (!%p425_p7)  ;;  %v660_v28 = vmov (!%p425_p7), 0.0|0.0   ;;  %vm661_vm0 = vmmov (!%p425_p7), 0   ;;  %v662_v31 = vmov (!%p425_p7), 0.0  }
  0x5c   : > { %214 = sbr.rel (%p425_p7) target bundleno = 350 (0x15e), region = 48  ;;  %484 = vmatprep.subr.bf16.mxu0 (!%p425_p7), %v660_v28  ;;  %v485_v29 = vpack.c.bf16 (!%p425_p7), %v269_v25, %v268_v24  ;;  %v271_v30 = vld [vmem:[%s892_s1 + $0x18] sm:$0xff] (!%p425_p7)  ;;  %481 = vmatprep.mubr.msk.f32.mxu0 (!%p425_p7), %vm661_vm0, %v662_v31  ;;  %s426_s7 = sshll.u32 (!%p425_p7), %s703_s16, 6  ;;  %v272_v35 = vld [vmem:[%s892_s1 + $0x20] sm:$0xff] (!%p425_p7)  ;;  %v273_v36 = vld [vmem:[%s892_s1 + $0x28] sm:$0xff] (!%p425_p7)  ;;  %vm356_vm9 = vcmask (!%p425_p7), 16384  }
  0x5d   : > { %s224_s8 = ssub.s32 (!%p425_p7), 250, %s426_s7  ;;  %v226_v32 = vshrl.u32 (!%p425_p7), %v225_v27, 7  ;;  %v488_v33 = vpack.c.bf16 (!%p425_p7), %v271_v30, %v270_v26  ;;  %v215_v39 = vld [vmem:[%s770_s28] sm:$0xff] (!%p425_p7)  ;;  %v216_v41 = vld [vmem:[%s770_s28 + $0x8] sm:$0xff] (!%p425_p7)  ;;  %v217_v42 = vld [vmem:[%s770_s28 + $0x10] sm:$0xff] (!%p425_p7)  ;;  %v491_v44 = vpack.c.bf16 (!%p425_p7), %v273_v36, %v272_v35 }
  0x5e   : > { %486 = vmatpush3.bf16.msra.mxu0 (!%p425_p7), %v485_v29  ;;  %v234_v34 = vstv (!%p425_p7), %s224_s8  ;;  %v274_v45 = vld [vmem:[%s892_s1 + $0x30] sm:$0xff] (!%p425_p7)  ;;  %v275_v46 = vld [vmem:[%s892_s1 + $0x38] sm:$0xff] (!%p425_p7)  ;;  %v219_v52 = vld [vmem:[%s770_s28 + $0x20] sm:$0xff] (!%p425_p7) }
  0x5f   : > { %487 = vmatprep.subr.bf16.mxu0 (!%p425_p7), %v660_v28  ;;  %v227_v37 = vadd.s32 (!%p425_p7), 8, %v226_v32  ;;  %v228_v38 = vadd.s32 (!%p425_p7), 16, %v226_v32  ;;  %v229_v40 = vadd.s32 (!%p425_p7), 24, %v226_v32  ;;  %v230_v43 = vadd.s32 (!%p425_p7), 32, %v226_v32  ;;  %v218_v47 = vld [vmem:[%s770_s28 + $0x18] sm:$0xff] (!%p425_p7)  ;;  %v277_v58 = vld [vmem:[%s892_s1 + $0x48] sm:$0xff] (!%p425_p7) }
  0x60   : > { %vm235_vm1 = vcmp.lt.s32.totalorder (!%p425_p7), %v226_v32, %v234_v34  ;;  %v231_v48 = vadd.s32 (!%p425_p7), 40, %v226_v32  ;;  %v232_v53 = vadd.s32 (!%p425_p7), 48, %v226_v32  ;;  %v494_v55 = vpack.c.bf16 (!%p425_p7), %v275_v46, %v274_v45  ;;  %v276_v57 = vld [vmem:[%s892_s1 + $0x40] sm:$0xff] (!%p425_p7)  ;;  %v220_v59 = vld [vmem:[%s770_s28 + $0x28] sm:$0xff] (!%p425_p7)  ;;  %v221_v63 = vld [vmem:[%s770_s28 + $0x30] sm:$0xff] (!%p425_p7) }
  0x61   : > { %vm236_vm2 = vcmp.lt.s32.totalorder (!%p425_p7), %v227_v37, %v234_v34  ;;  %vm237_vm3 = vcmp.lt.s32.totalorder (!%p425_p7), %v228_v38, %v234_v34  ;;  %vm238_vm4 = vcmp.lt.s32.totalorder (!%p425_p7), %v229_v40, %v234_v34  ;;  %v243_v49 = vsel (!%p425_p7), %vm235_vm1, %v215_v39, 0.0  ;;  %v278_v3 = vld [vmem:[%s892_s1 + $0x50] sm:$0xff] (!%p425_p7)  ;;  %v279_v4 = vld [vmem:[%s892_s1 + $0x58] sm:$0xff] (!%p425_p7)  ;;  %v280_v11 = vld [vmem:[%s892_s1 + $0x60] sm:$0xff] (!%p425_p7) }
  0x62   : > { %489 = vmatpush3.bf16.msra.mxu0 (!%p425_p7), %v488_v33  ;;  %v244_v50 = vsel (!%p425_p7), %vm236_vm2, %v216_v41, 0.0  ;;  %v245_v51 = vsel (!%p425_p7), %vm237_vm3, %v217_v42, 0.0  ;;  %vm239_vm5 = vcmp.lt.s32.totalorder (!%p425_p7), %v230_v43, %v234_v34  ;;  %v246_v56 = vsel (!%p425_p7), %vm238_vm4, %v218_v47, 0.0  ;;  %v222_v5 = vld [vmem:[%s770_s28 + $0x38] sm:$0xff] (!%p425_p7)  ;;  %v281_v12 = vld [vmem:[%s892_s1 + $0x68] sm:$0xff] (!%p425_p7)  ;;  %v282_v16 = vld [vmem:[%s892_s1 + $0x70] sm:$0xff] (!%p425_p7) }
  0x63   : > { %490 = vmatprep.subr.bf16.mxu0 %v660_v28  ;;  %v252_v54 = vadd.f32 %v244_v50, %v243_v49  ;;  %v233_v60 = vadd.s32 56, %v226_v32  ;;  %vm240_vm6 = vcmp.lt.s32.totalorder %v231_v48, %v234_v34  ;;  %v247_v62 = vsel %vm239_vm5, %v219_v52, 0.0  ;;  %v283_v17 = vld [vmem:[%s892_s1 + $0x78] sm:$0xff]  ;;  %v251_v24 = vld [vmem:[#allocation2] sm:$0x1] }
  0x64   : > { %vm241_vm7 = vcmp.lt.s32.totalorder %v232_v53, %v234_v34  ;;  %v497_v1 = vpack.c.bf16 %v277_v58, %v276_v57  ;;  %v248_v2 = vsel %vm240_vm6, %v220_v59, 0.0  ;;  %v500_v9 = vpack.c.bf16 %v279_v4, %v278_v3  ;;  %v284_v29 = vld [vmem:[%s893_s2] sm:$0x1] }
  0x65   : > { %v253_v61 = vadd.f32 %v252_v54, %v245_v51  ;;  %vm242_vm8 = vcmp.lt.s32.totalorder %v233_v60, %v234_v34  ;;  %v249_v7 = vsel %vm241_vm7, %v221_v63, 0.0  ;;  %v503_v15 = vpack.c.bf16 %v281_v12, %v280_v11 }
  0x66   : > { %492 = vmatpush3.bf16.msra.mxu0 %v491_v44  ;;  %v250_v10 = vsel %vm242_vm8, %v222_v5, 0.0  ;;  %v506_v20 = vpack.c.bf16 %v283_v17, %v282_v16  ;;  %v285_v30 = vmul.f32 1000.0, %v284_v29 }
  0x67   : > { %493 = vmatprep.subr.bf16.mxu0 %v660_v28  ;;  %v254_v0 = vadd.f32 %v253_v61, %v246_v56 }
  0x69   : > { %v255_v6 = vadd.f32 %v254_v0, %v247_v62 }
  0x6a   : > { %495 = vmatpush3.bf16.msra.mxu0 %v494_v55 }
  0x6b   : > { %496 = vmatprep.subr.bf16.mxu0 %v660_v28  ;;  %v256_v8 = vadd.f32 %v255_v6, %v248_v2 }
  0x6d   : > { %v257_v13 = vadd.f32 %v256_v8, %v249_v7 }
  0x6e   : > { %498 = vmatpush3.bf16.msra.mxu0 %v497_v1 }
  0x6f   : > { %499 = vmatprep.subr.bf16.mxu0 %v660_v28  ;;  %v258_v14 = vadd.f32 %v257_v13, %v250_v10 }
  0x71   : > { %v259_v18 = vrot.slane %v258_v14, 4 }
  0x72   : > { %501 = vmatpush3.bf16.msra.mxu0 %v500_v9 }
  0x73   : > { %502 = vmatprep.subr.bf16.mxu0 %v660_v28  ;;  %v260_v19 = vadd.f32 %v259_v18, %v258_v14 }
  0x75   : > { %v261_v21 = vrot.slane %v260_v19, 2 }
  0x76   : > { %504 = vmatpush3.bf16.msra.mxu0 %v503_v15 }
  0x77   : > { %505 = vmatprep.subr.bf16.mxu0 %v660_v28  ;;  %v262_v22 = vadd.f32 %v261_v21, %v260_v19 }
  0x79   : > { %v263_v23 = vrot.slane %v262_v22, 1 }
  0x7a   : > { %507 = vmatpush3.bf16.msra.mxu0 %v506_v20 }
  0x7b   : > { %v264_v25 = vadd.f32 %v263_v23, %v262_v22 }
  0x7d   : > { %v265_v26 = vadd.f32 %v264_v25, %v251_v24 }
  0x7f   : > { %266 = vst [vmem:[#allocation2] sm:$0x1] %v265_v26 }
  0x86   : > { %v267_v27 = vld [vmem:[#allocation2] sm:$0x1] }
  0x87   : > { %482 = vmatmul.mubr.f32.vlgmr.msra.gmra.mrb[0].mxu0 %v267_v27 }
 0x15a   : > { %v352_v31 = vpop.f32.mrb[0].mxu0 }
 0x15b   : > { %v353_v32 = vadd.f32 %v352_v31, %v285_v30  ;;  %v483_v33 = vpop.f32.mrb[1].mxu0 }
 0x15d   : > { %357 = vst.msk [vmem:[#allocation6] sm:$0x1] %vm356_vm9, %v353_v32 }
 0x15e PF: > { %p519_p4 = scmp.eq.s32.totalorder %s703_s16, 3  ;;  %s663_s18 = smov [#allocation6]  }
 0x15f   : > { %s365_s19 = sshll.u32 %s663_s18, 4  ;;  %s366_s19 = int_to_ptr.vmem [resolvable:$true] %s365_s19 }
 0x160   : > { %s590_s22 = scalar_lea.vmem %s366_s19, 16  ;;  %s596_s23 = scalar_lea.vmem %s366_s19, 32 }
 0x161   : > { %p591_p5 = scmp.ne.s32.totalorder %s366_s19, %s590_s22  ;;  %p597_p12 = scmp.lt.s32.totalorder %s366_s19, %s366_s19 }
 0x162   : > { %p598_p0 = scmp.lt.s32.totalorder %s596_s23, %s590_s22 }
 0x163   : > { %p592_p6 = pnand %p591_p5, %p519_p4 }
 0x164   : > { %p599_p1 = por %p598_p0, %p597_p12 }
 0x165   : > { %p593_p10 = pneg %p592_p6 }
 0x167   : > { %p600_p2 = pnand %p599_p1, %p593_p10 }
 0x169   : > { %603 = shalt.err (!%p600_p2)
}
 0x16a   : > { %s604_s26 = scalar_lea.hbm %s894_s3, 16 }
 0x16b   : > { %p605_p11 = scmp.ne.s32.totalorder %s894_s3, %s604_s26  ;;  %p610_p9 = scmp.lt.u32.totalorder %s604_s26, %s894_s3 }
 0x16d   : > { %p606_p13 = pnand %p605_p11, %p519_p4 }
 0x16f   : > { %p607_p3 = pneg %p606_p13 }
 0x171   : > { %p612_p8 = pnand %p610_p9, %p607_p3 }
 0x173   : > { %615 = shalt.err (!%p612_p8)
}
 0x174   : > { %511 = dma.vmem_to_hbm [thread:$0]  (%p519_p4), %s366_s19, 16, %s894_s3, [#allocation5]  }
 0x175   : > { %637 = dma.done.wait (%p519_p4), [#allocation5], 16  }
 0x176   : > { %639 = vsyncadd (%p519_p4), [#allocation5], 4294967280 }
 0x177 PF: > { %p14_p7 = scmp.ge.s32.totalorder %s706_s17, 6   ;;  %s898_s12 = smov %s646_s13 }
 0x178   : > { %s899_s13 = smov %s650_s14  ;;  %s900_s14 = smov %s716_s20 }
 0x179   : > { %s901_s15 = smov %s706_s17  ;;  %16 = sbr.rel (!%p14_p7) target bundleno = 4 (0x4), region = 81 }
 0x180   :  { %378 = vsyncpa [#allocation4], 1 }
 0x181   :  { %380 = vsyncpa [#allocation4 + $0x1], 1 }
 0x182   :  { %381 = vsyncpa [#allocation5], 1 }
 0x183   :  { %383 = vsyncpa [#allocation5 + $0x1], 1 }

</bundles_post_ra>
